<compile_context>
chip_gen: v5e
topology: v5e:2x2
jax: 0.10.0
libtpu: 0.0.40
codegen_flags: <defaults>
</compile_context>

<pallas_src>
import jax
import jax.numpy as jnp
from jax.experimental import pallas as pl
from jax.experimental.pallas import tpu as pltpu

EPS = 1e-5


def _encoder_kernel(x_ref, w_ref, b_ref, g_ref, beta_ref, o_ref):
    # Linear: native-dtype operands on the MXU, f32 accumulation.
    y = jnp.dot(x_ref[...], w_ref[...], preferred_element_type=jnp.float32)
    y = y + b_ref[...].astype(jnp.float32)

    # LayerNorm over the last dim, single-pass statistics (biased variance, as nn.LayerNorm).
    inv_d = 1.0 / y.shape[-1]
    mean = jnp.sum(y, axis=-1, keepdims=True) * inv_d
    mean_sq = jnp.sum(y * y, axis=-1, keepdims=True) * inv_d
    var = mean_sq - mean * mean
    y_norm = (y - mean) * jax.lax.rsqrt(var + EPS)

    out = y_norm * g_ref[...].astype(jnp.float32) + beta_ref[...].astype(jnp.float32)
    # Dropout (eval mode) == identity.
    o_ref[...] = out.astype(o_ref.dtype)


def linear_positional_encoder(x, weight, bias, gamma, beta, *, tile_m=512):
    """x: (batch, seq, input_dim). weight: (input_dim, d_model) (= torch weight.T).

    tile_m: rows per grid step. Sweep 256/512/1024 on real shapes; keep it a multiple of 256
    (MXU rows on v6e/v7x; also a multiple of 128 for v5e). It is clamped to the row count.
    """
    batch, seq, input_dim = x.shape
    d_model = weight.shape[1]
    M = batch * seq

    # Never exceed the row count: a full-extent block is always layout-legal, and small
    # problems don't need (or fit) huge tiles.
    tile_m = min(tile_m, M)
    grid = (pl.cdiv(M, tile_m),)  # ragged last block is masked by Pallas

    x2 = x.reshape(M, input_dim)
    b2 = bias.reshape(1, d_model)
    g2 = gamma.reshape(1, d_model)
    be2 = beta.reshape(1, d_model)

    # VMEM budget: streaming tiles double-buffered, grid-invariant operands single-buffered.
    itemsize = x.dtype.itemsize
    vmem_need = (
        2 * tile_m * input_dim * itemsize                 # x tile (double buffered)
        + 2 * tile_m * d_model * itemsize                 # out tile (double buffered)
        + input_dim * d_model * weight.dtype.itemsize     # W (single buffered)
        + 3 * d_model * 4                                 # bias / gamma / beta
    )
    # Stay within v7x's 64 MiB physical VMEM; never below the common 32 MiB scoped default.
    vmem_limit = int(min(64 << 20, max(32 << 20, 2 * vmem_need)))

    def _build(const_pipeline_mode):
        pm_kwargs = {} if const_pipeline_mode is None else {"pipeline_mode": const_pipeline_mode}

        def const_spec(shape):
            # Grid-invariant operand: constant block index, optionally single-buffered.
            return pl.BlockSpec(shape, lambda i: (0, 0), **pm_kwargs)

        return pl.pallas_call(
            _encoder_kernel,
            out_shape=jax.ShapeDtypeStruct((M, d_model), x.dtype),
            grid_spec=pltpu.PrefetchScalarGridSpec(
                num_scalar_prefetch=0,
                grid=grid,
                in_specs=[
                    pl.BlockSpec((tile_m, input_dim), lambda i: (i, 0)),  # streamed x rows
                    const_spec((input_dim, d_model)),                     # W
                    const_spec((1, d_model)),                             # bias
                    const_spec((1, d_model)),                             # gamma
                    const_spec((1, d_model)),                             # beta
                ],
                out_specs=pl.BlockSpec((tile_m, d_model), lambda i: (i, 0)),
            ),
            compiler_params=pltpu.CompilerParams(
                dimension_semantics=("parallel",),  # rows independent -> shard grid across TCs
                vmem_limit_bytes=vmem_limit,
            ),
        )

    try:
        # Single-buffer the grid-invariant operands (they are DMA'd once; no need for 2 buffers).
        out = _build(pl.Buffered(1))(x2, weight, b2, g2, be2)
    except Exception:
        # Compatibility fallback if this jax build rejects pipeline_mode on top-level pallas_call;
        # default (double-buffered) specs are still correct and only cost a little extra VMEM.
        out = _build(None)(x2, weight, b2, g2, be2)

    return out.reshape(batch, seq, d_model)


def _reference(x, weight, bias, gamma, beta):
    y = jnp.einsum("bsi,id->bsd", x, weight) + bias
    mean = jnp.mean(y, axis=-1, keepdims=True)
    var = jnp.mean((y - mean) ** 2, axis=-1, keepdims=True)
    y = (y - mean) / jnp.sqrt(var + EPS)
    return y * gamma + beta


if __name__ == "__main__":
    key = jax.random.PRNGKey(0)
    k_x, k_w, k_b, k_g, k_be, k_x2 = jax.random.split(key, 6)

    # Small shapes consistent with the module's forward.
    batch, seq, input_dim, d_model = 2, 8, 32, 128

    x = jax.random.normal(k_x, (batch, seq, input_dim), dtype=jnp.float32)
    # nn.Linear(input_dim, d_model): torch weight is (d_model, input_dim) — store transposed.
    bound = 1.0 / (input_dim ** 0.5)
    weight = jax.random.uniform(k_w, (input_dim, d_model), jnp.float32, -bound, bound)
    bias = jax.random.uniform(k_b, (d_model,), jnp.float32, -bound, bound)
    # nn.LayerNorm(d_model) params (perturbed from the default 1/0 for a stronger test).
    gamma = 1.0 + 0.01 * jax.random.normal(k_g, (d_model,), dtype=jnp.float32)
    beta = 0.01 * jax.random.normal(k_be, (d_model,), dtype=jnp.float32)

    out = linear_positional_encoder(x, weight, bias, gamma, beta)
    out = jax.block_until_ready(out)
    ref = _reference(x, weight, bias, gamma, beta)
    assert out.shape == (batch, seq, d_model)
    assert jnp.allclose(out, ref, atol=1e-4, rtol=1e-4), "mismatch vs reference (small)"

    # Ragged-grid check: M = 3*70 = 210 rows, tile_m=64 -> grid of 4 steps with a masked tail.
    x_big = jax.random.normal(k_x2, (3, 70, input_dim), dtype=jnp.float32)
    out_big = jax.block_until_ready(
        linear_positional_encoder(x_big, weight, bias, gamma, beta, tile_m=64)
    )
    ref_big = _reference(x_big, weight, bias, gamma, beta)
    assert jnp.allclose(out_big, ref_big, atol=1e-4, rtol=1e-4), "mismatch vs reference (ragged)"

    print("KERNEL_OK")
</pallas_src>

<mosaic_0001>
module attributes {stable_mosaic.version = 11 : i64} {
  func.func @_encoder_kernel(%arg0: i32, %arg1: memref<16x32xf32, #tpu.memory_space<vmem>>, %arg2: memref<32x128xf32, #tpu.memory_space<vmem>>, %arg3: memref<1x128xf32, #tpu.memory_space<vmem>>, %arg4: memref<1x128xf32, #tpu.memory_space<vmem>>, %arg5: memref<1x128xf32, #tpu.memory_space<vmem>>, %arg6: memref<16x128xf32, #tpu.memory_space<vmem>>) attributes {dimension_semantics = [#tpu.dimension_semantics<parallel>], iteration_bounds = array<i64: 1>, scalar_prefetch = 0 : i64, scratch_operands = 0 : i64, tpu.core_type = #tpu.core_type<tc>, window_params = [{transform_indices = @transform_0, window_bounds = array<i64: 16, 32>}, {pipeline_mode = #tpu.pipeline_mode<synchronous>, transform_indices = @transform_1, window_bounds = array<i64: 32, 128>}, {pipeline_mode = #tpu.pipeline_mode<synchronous>, transform_indices = @transform_2, window_bounds = array<i64: 1, 128>}, {pipeline_mode = #tpu.pipeline_mode<synchronous>, transform_indices = @transform_3, window_bounds = array<i64: 1, 128>}, {pipeline_mode = #tpu.pipeline_mode<synchronous>, transform_indices = @transform_4, window_bounds = array<i64: 1, 128>}, {transform_indices = @transform_5, window_bounds = array<i64: 16, 128>}]} {
    %c0 = arith.constant 0 : index
    %c0_0 = arith.constant 0 : index
    %0 = vector.load %arg1[%c0, %c0_0] : memref<16x32xf32, #tpu.memory_space<vmem>>, vector<16x32xf32>
    %c0_1 = arith.constant 0 : index
    %c0_2 = arith.constant 0 : index
    %1 = vector.load %arg2[%c0_1, %c0_2] : memref<32x128xf32, #tpu.memory_space<vmem>>, vector<32x128xf32>
    %cst = arith.constant dense<0.000000e+00> : vector<16x128xf32>
    %2 = tpu.matmul %0, %1, %cst {dimension_numbers = #tpu.dot_dimension_numbers<[1], [0], [0], [1], [0, 0, 1, 1], [], []>} : vector<16x32xf32>, vector<32x128xf32>, vector<16x128xf32> -> vector<16x128xf32>
    %c0_3 = arith.constant 0 : index
    %c0_4 = arith.constant 0 : index
    %3 = vector.load %arg3[%c0_3, %c0_4] : memref<1x128xf32, #tpu.memory_space<vmem>>, vector<1x128xf32>
    %4 = vector.broadcast %3 : vector<1x128xf32> to vector<16x128xf32>
    %5 = arith.addf %2, %4 : vector<16x128xf32>
    %cst_5 = arith.constant dense<0.000000e+00> : vector<16xf32>
    %6 = vector.multi_reduction <add>, %5, %cst_5 [1] : vector<16x128xf32> to vector<16xf32>
    %7 = vector.shape_cast %6 : vector<16xf32> to vector<16x1xf32>
    %cst_6 = arith.constant 7.812500e-03 : f32
    %8 = vector.broadcast %cst_6 : f32 to vector<16x1xf32>
    %9 = arith.mulf %7, %8 : vector<16x1xf32>
    %10 = arith.mulf %5, %5 : vector<16x128xf32>
    %cst_7 = arith.constant dense<0.000000e+00> : vector<16xf32>
    %11 = vector.multi_reduction <add>, %10, %cst_7 [1] : vector<16x128xf32> to vector<16xf32>
    %12 = vector.shape_cast %11 : vector<16xf32> to vector<16x1xf32>
    %cst_8 = arith.constant 7.812500e-03 : f32
    %13 = vector.broadcast %cst_8 : f32 to vector<16x1xf32>
    %14 = arith.mulf %12, %13 : vector<16x1xf32>
    %15 = arith.mulf %9, %9 : vector<16x1xf32>
    %16 = arith.subf %14, %15 : vector<16x1xf32>
    %17 = vector.broadcast %9 : vector<16x1xf32> to vector<16x128xf32>
    %18 = arith.subf %5, %17 : vector<16x128xf32>
    %cst_9 = arith.constant 9.99999974E-6 : f32
    %19 = vector.broadcast %cst_9 : f32 to vector<16x1xf32>
    %20 = arith.addf %16, %19 : vector<16x1xf32>
    %21 = math.rsqrt %20 : vector<16x1xf32>
    %22 = vector.broadcast %21 : vector<16x1xf32> to vector<16x128xf32>
    %23 = arith.mulf %18, %22 : vector<16x128xf32>
    %c0_10 = arith.constant 0 : index
    %c0_11 = arith.constant 0 : index
    %24 = vector.load %arg4[%c0_10, %c0_11] : memref<1x128xf32, #tpu.memory_space<vmem>>, vector<1x128xf32>
    %25 = vector.broadcast %24 : vector<1x128xf32> to vector<16x128xf32>
    %26 = arith.mulf %23, %25 : vector<16x128xf32>
    %c0_12 = arith.constant 0 : index
    %c0_13 = arith.constant 0 : index
    %27 = vector.load %arg5[%c0_12, %c0_13] : memref<1x128xf32, #tpu.memory_space<vmem>>, vector<1x128xf32>
    %28 = vector.broadcast %27 : vector<1x128xf32> to vector<16x128xf32>
    %29 = arith.addf %26, %28 : vector<16x128xf32>
    %c0_14 = arith.constant 0 : index
    %c0_15 = arith.constant 0 : index
    %30 = vector.load %arg6[%c0_14, %c0_15] : memref<16x128xf32, #tpu.memory_space<vmem>>, vector<16x128xf32>
    tpu.vector_store %arg6[%c0_14, %c0_15], %29 {strides = array<i32>} : memref<16x128xf32, #tpu.memory_space<vmem>>, vector<16x128xf32>,
    return
  }
  func.func @transform_0(%arg0: i32) -> (i32, i32) {
    %c0_i32 = arith.constant 0 : i32
    %c0_i32_0 = arith.constant 0 : i32
    return %arg0, %c0_i32 : i32, i32
  }
  func.func @transform_1(%arg0: i32) -> (i32, i32) {
    %c0_i32 = arith.constant 0 : i32
    %c0_i32_0 = arith.constant 0 : i32
    %c0_i32_1 = arith.constant 0 : i32
    return %c0_i32, %c0_i32_0 : i32, i32
  }
  func.func @transform_2(%arg0: i32) -> (i32, i32) {
    %c0_i32 = arith.constant 0 : i32
    %c0_i32_0 = arith.constant 0 : i32
    %c0_i32_1 = arith.constant 0 : i32
    return %c0_i32, %c0_i32_0 : i32, i32
  }
  func.func @transform_3(%arg0: i32) -> (i32, i32) {
    %c0_i32 = arith.constant 0 : i32
    %c0_i32_0 = arith.constant 0 : i32
    %c0_i32_1 = arith.constant 0 : i32
    return %c0_i32, %c0_i32_0 : i32, i32
  }
  func.func @transform_4(%arg0: i32) -> (i32, i32) {
    %c0_i32 = arith.constant 0 : i32
    %c0_i32_0 = arith.constant 0 : i32
    %c0_i32_1 = arith.constant 0 : i32
    return %c0_i32, %c0_i32_0 : i32, i32
  }
  func.func @transform_5(%arg0: i32) -> (i32, i32) {
    %c0_i32 = arith.constant 0 : i32
    %c0_i32_0 = arith.constant 0 : i32
    return %arg0, %c0_i32 : i32, i32
  }
}

module attributes {stable_mosaic.version = 11 : i64} {
  func.func @_encoder_kernel(%arg0: i32, %arg1: memref<16x32xf32, #tpu.memory_space<vmem>>, %arg2: memref<32x128xf32, #tpu.memory_space<vmem>>, %arg3: memref<1x128xf32, #tpu.memory_space<vmem>>, %arg4: memref<1x128xf32, #tpu.memory_space<vmem>>, %arg5: memref<1x128xf32, #tpu.memory_space<vmem>>, %arg6: memref<16x128xf32, #tpu.memory_space<vmem>>) attributes {dimension_semantics = [#tpu.dimension_semantics<parallel>], iteration_bounds = array<i64: 1>, scalar_prefetch = 0 : i64, scratch_operands = 0 : i64, tpu.core_type = #tpu.core_type<tc>, window_params = [{transform_indices = @transform_0, window_bounds = array<i64: 16, 32>}, {pipeline_mode = #tpu.pipeline_mode<synchronous>, transform_indices = @transform_1, window_bounds = array<i64: 32, 128>}, {pipeline_mode = #tpu.pipeline_mode<synchronous>, transform_indices = @transform_2, window_bounds = array<i64: 1, 128>}, {pipeline_mode = #tpu.pipeline_mode<synchronous>, transform_indices = @transform_3, window_bounds = array<i64: 1, 128>}, {pipeline_mode = #tpu.pipeline_mode<synchronous>, transform_indices = @transform_4, window_bounds = array<i64: 1, 128>}, {transform_indices = @transform_5, window_bounds = array<i64: 16, 128>}]} {
    %c0 = arith.constant 0 : index
    %c0_0 = arith.constant 0 : index
    %0 = vector.load %arg1[%c0, %c0_0] : memref<16x32xf32, #tpu.memory_space<vmem>>, vector<16x32xf32>
    %c0_1 = arith.constant 0 : index
    %c0_2 = arith.constant 0 : index
    %1 = vector.load %arg2[%c0_1, %c0_2] : memref<32x128xf32, #tpu.memory_space<vmem>>, vector<32x128xf32>
    %cst = arith.constant dense<0.000000e+00> : vector<16x128xf32>
    %2 = tpu.matmul %0, %1, %cst {dimension_numbers = #tpu.dot_dimension_numbers<[1], [0], [0], [1], [0, 0, 1, 1], [], []>} : vector<16x32xf32>, vector<32x128xf32>, vector<16x128xf32> -> vector<16x128xf32>
    %c0_3 = arith.constant 0 : index
    %c0_4 = arith.constant 0 : index
    %3 = vector.load %arg3[%c0_3, %c0_4] : memref<1x128xf32, #tpu.memory_space<vmem>>, vector<1x128xf32>
    %4 = vector.broadcast %3 : vector<1x128xf32> to vector<16x128xf32>
    %5 = arith.addf %2, %4 : vector<16x128xf32>
    %cst_5 = arith.constant dense<0.000000e+00> : vector<16xf32>
    %6 = vector.multi_reduction <add>, %5, %cst_5 [1] : vector<16x128xf32> to vector<16xf32>
    %7 = vector.shape_cast %6 : vector<16xf32> to vector<16x1xf32>
    %cst_6 = arith.constant 7.812500e-03 : f32
    %8 = vector.broadcast %cst_6 : f32 to vector<16x1xf32>
    %9 = arith.mulf %7, %8 : vector<16x1xf32>
    %10 = arith.mulf %5, %5 : vector<16x128xf32>
    %cst_7 = arith.constant dense<0.000000e+00> : vector<16xf32>
    %11 = vector.multi_reduction <add>, %10, %cst_7 [1] : vector<16x128xf32> to vector<16xf32>
    %12 = vector.shape_cast %11 : vector<16xf32> to vector<16x1xf32>
    %cst_8 = arith.constant 7.812500e-03 : f32
    %13 = vector.broadcast %cst_8 : f32 to vector<16x1xf32>
    %14 = arith.mulf %12, %13 : vector<16x1xf32>
    %15 = arith.mulf %9, %9 : vector<16x1xf32>
    %16 = arith.subf %14, %15 : vector<16x1xf32>
    %17 = vector.broadcast %9 : vector<16x1xf32> to vector<16x128xf32>
    %18 = arith.subf %5, %17 : vector<16x128xf32>
    %cst_9 = arith.constant 9.99999974E-6 : f32
    %19 = vector.broadcast %cst_9 : f32 to vector<16x1xf32>
    %20 = arith.addf %16, %19 : vector<16x1xf32>
    %21 = math.rsqrt %20 : vector<16x1xf32>
    %22 = vector.broadcast %21 : vector<16x1xf32> to vector<16x128xf32>
    %23 = arith.mulf %18, %22 : vector<16x128xf32>
    %c0_10 = arith.constant 0 : index
    %c0_11 = arith.constant 0 : index
    %24 = vector.load %arg4[%c0_10, %c0_11] : memref<1x128xf32, #tpu.memory_space<vmem>>, vector<1x128xf32>
    %25 = vector.broadcast %24 : vector<1x128xf32> to vector<16x128xf32>
    %26 = arith.mulf %23, %25 : vector<16x128xf32>
    %c0_12 = arith.constant 0 : index
    %c0_13 = arith.constant 0 : index
    %27 = vector.load %arg5[%c0_12, %c0_13] : memref<1x128xf32, #tpu.memory_space<vmem>>, vector<1x128xf32>
    %28 = vector.broadcast %27 : vector<1x128xf32> to vector<16x128xf32>
    %29 = arith.addf %26, %28 : vector<16x128xf32>
    %c0_14 = arith.constant 0 : index
    %c0_15 = arith.constant 0 : index
    %30 = vector.load %arg6[%c0_14, %c0_15] : memref<16x128xf32, #tpu.memory_space<vmem>>, vector<16x128xf32>
    tpu.vector_store %arg6[%c0_14, %c0_15], %29 {strides = array<i32>} : memref<16x128xf32, #tpu.memory_space<vmem>>, vector<16x128xf32>,
    return
  }
  func.func @transform_0(%arg0: i32) -> (i32, i32) {
    %c0_i32 = arith.constant 0 : i32
    %c0_i32_0 = arith.constant 0 : i32
    return %arg0, %c0_i32 : i32, i32
  }
  func.func @transform_1(%arg0: i32) -> (i32, i32) {
    %c0_i32 = arith.constant 0 : i32
    %c0_i32_0 = arith.constant 0 : i32
    %c0_i32_1 = arith.constant 0 : i32
    return %c0_i32, %c0_i32_0 : i32, i32
  }
  func.func @transform_2(%arg0: i32) -> (i32, i32) {
    %c0_i32 = arith.constant 0 : i32
    %c0_i32_0 = arith.constant 0 : i32
    %c0_i32_1 = arith.constant 0 : i32
    return %c0_i32, %c0_i32_0 : i32, i32
  }
  func.func @transform_3(%arg0: i32) -> (i32, i32) {
    %c0_i32 = arith.constant 0 : i32
    %c0_i32_0 = arith.constant 0 : i32
    %c0_i32_1 = arith.constant 0 : i32
    return %c0_i32, %c0_i32_0 : i32, i32
  }
  func.func @transform_4(%arg0: i32) -> (i32, i32) {
    %c0_i32 = arith.constant 0 : i32
    %c0_i32_0 = arith.constant 0 : i32
    %c0_i32_1 = arith.constant 0 : i32
    return %c0_i32, %c0_i32_0 : i32, i32
  }
  func.func @transform_5(%arg0: i32) -> (i32, i32) {
    %c0_i32 = arith.constant 0 : i32
    %c0_i32_0 = arith.constant 0 : i32
    return %arg0, %c0_i32 : i32, i32
  }
}

</mosaic_0001>

<bundles_post_ra>
// kernel: tpu_custom_call.1
= control target key start
LH: loop header
LB: loop body
LE: loop exit
PB: predicated region body
PF: predicated region fallthrough
CT: control target
= control target key end

     0   :  { %10 = vsyncpa [#allocation3], 0  ;;  %s329_s0 = inlined_call_operand.hbm [shape: f32[16,32], index: 0, kind: input, shape index: {}]   ;;  %s330_s1 = inlined_call_operand.hbm [shape: f32[32,128], index: 1, kind: input, shape index: {}]   ;;  %s331_s2 = inlined_call_operand.vmem [shape: f32[1,128], index: 2, kind: input, shape index: {}]   ;;  %s332_s3 = inlined_call_operand.vmem [shape: f32[1,128], index: 3, kind: input, shape index: {}]   ;;  %s333_s4 = inlined_call_operand.vmem [shape: f32[1,128], index: 4, kind: input, shape index: {}]   ;;  %s334_s5 = inlined_call_operand.hbm [shape: f32[16,128], index: 5, kind: output, shape index: {}]  }
   0x1   :  { %11 = vsyncpa [#allocation6], 0 }
   0x2   :  { %12 = vsyncpa [#allocation4], 0  ;;  %s17_s20 = sshll.u32 %s329_s0, 4  ;;  %s267_s21 = smov [#allocation2]   ;;  %s18_s20 = int_to_ptr.hbm [resolvable:$true] %s17_s20 }
   0x3   :  { %s19_s22 = sshll.u32 %s267_s21, 4  ;;  %s30_s25 = sshll.u32 %s330_s1, 4  ;;  %s20_s22 = int_to_ptr.vmem [resolvable:$true] %s19_s22  ;;  %s31_s25 = int_to_ptr.hbm [resolvable:$true] %s30_s25 }
   0x4   :  { %s268_s26 = smov 128   ;;  %s269_s27 = smov 8  }
   0x5   :  { %25 = dma.hbm_to_vmem [thread:$0]  %s18_s20, 256, %s20_s22, [#allocation3], %s268_s26, %s268_s26, %s269_s27  }
   0x6   :  { %s270_s28 = smov [#allocation5]  }
   0x7   :  { %s32_s29 = sshll.u32 %s270_s28, 4  ;;  %s33_s29 = int_to_ptr.vmem [resolvable:$true] %s32_s29 }
   0x8   :  { %38 = dma.hbm_to_vmem [thread:$0]  %s31_s25, 512, %s33_s29, [#allocation6], %s268_s26, %s268_s26, %s269_s27  }
   0x9   :  { %261 = dma.done.wait [#allocation3], 256  }
   0xa   :  { %262 = vsyncadd [#allocation3], 4294967040 }
   0xb   :  { %263 = dma.done.wait [#allocation6], 512  }
   0xc   :  { %264 = vsyncadd [#allocation6], 4294966784  ;;  %v58_v0 = vld [vmem:[#allocation5 + $0x18] sm:$0xff]  ;;  %v57_v1 = vld [vmem:[#allocation5 + $0x10] sm:$0xff]  ;;  %vm63_vm0 = vcmask 261120   ;;  %s157_s11 = sshll.u32 %s334_s5, 4  ;;  %s158_s11 = int_to_ptr.hbm [resolvable:$true] %s157_s11 }
   0xd   :  { %82 = vmatpush.msra.mxu0 %v58_v0  ;;  %173 = vmatpush.msra.mxu1 %v58_v0  ;;  %v56_v2 = vld [vmem:[#allocation5 + $0x8] sm:$0xff]  ;;  %v55_v3 = vld [vmem:[#allocation5] sm:$0xff]  ;;  %v53_v4 = vld [vmem:[#allocation2] sm:$0xff] }
   0xe   :  { %v54_v5 = vld [vmem:[#allocation2 + $0x8] sm:$0xff]  ;;  %v182_v6 = vld [vmem:[%s331_s2] ss:$0 sm:$0xff] }
   0xf   :  { %83 = vmatpush.msra.mxu0 %v57_v1  ;;  %174 = vmatpush.msra.mxu1 %v57_v1  ;;  %v183_v36 = vld [vmem:[%s332_s3] ss:$0 sm:$0xff]  ;;  %s271_s3 = smov [#allocation7]  }
  0x10   :  { %v184_v40 = vld [vmem:[%s333_s4] ss:$0 sm:$0xff]  ;;  %s155_s8 = sshll.u32 %s271_s3, 4  ;;  %s156_s8 = int_to_ptr.vmem [resolvable:$true] %s155_s8 }
  0x11   :  { %84 = vmatpush.msra.mxu0 %v56_v2  ;;  %175 = vmatpush.msra.mxu1 %v56_v2 }
  0x13   :  { %85 = vmatpush.msra.mxu0 %v55_v3  ;;  %176 = vmatpush.msra.mxu1 %v55_v3 }
  0x14   :  { %171 = vmatmul.msk.f32.vlgmr.msra.gmra.mxu0 %vm63_vm0, %v53_v4  ;;  %172 = vmatmul.msk.f32.vlgmr.msra.gmra.mxu1 %vm63_vm0, %v54_v5 }
  0x91   :  { %v87_v7 = vpop.f32.mrf.mxu0  ;;  %v90_v9 = vpop.f32.mrf.mxu1 }
  0x92   :  { %v88_v8 = vadd.f32 %v182_v6, %v87_v7  ;;  %v91_v11 = vadd.f32 %v182_v6, %v90_v9 }
  0x94   :  { %93 = vadd.xlane.f32.xlu0 %v88_v8  ;;  %v99_v10 = vmul.f32 %v88_v8, %v88_v8  ;;  %v100_v12 = vmul.f32 %v91_v11, %v91_v11 }
  0x96   :  { %101 = vadd.xlane.f32.xlu1 %v99_v10 }
  0x9c   :  { %95 = vadd.xlane.f32.xlu0 %v91_v11 }
  0x9e   :  { %103 = vadd.xlane.f32.xlu1 %v100_v12 }
 0x107   :  { %v94_v13 = vpop.xlane.xlu0 %93 }
 0x108   :  { %v97_v14 = vmul.f32 0.0078125, %v94_v13 }
 0x109   :  { %v102_v15 = vpop.xlane.xlu1 %101 }
 0x10a   :  { %v107_v16 = vmul.f32 %v97_v14, %v97_v14  ;;  %v105_v17 = vmul.f32 0.0078125, %v102_v15  ;;  %v111_v35 = vsub.f32 %v88_v8, %v97_v14 }
 0x10c   :  { %v109_v18 = vsub.f32 %v105_v17, %v107_v16 }
 0x10e   :  { %v113_v19 = vadd.f32 1e-05, %v109_v18 }
 0x10f   :  { %v96_v20 = vpop.xlane.xlu0 %95 }
 0x110   :  { %185 = vrsqrt.f32 %v113_v19  ;;  %v98_v21 = vmul.f32 0.0078125, %v96_v20  ;;  %vm121_vm2 = vweird.f32 %v113_v19 }
 0x111   :  { %v104_v22 = vpop.xlane.xlu1 %103 }
 0x112   :  { %v108_v23 = vmul.f32 %v98_v21, %v98_v21  ;;  %v106_v24 = vmul.f32 0.0078125, %v104_v22  ;;  %v112_v46 = vsub.f32 %v91_v11, %v98_v21 }
 0x114   :  { %v110_v25 = vsub.f32 %v106_v24, %v108_v23 }
 0x116   :  { %v186_v26 = vpop.eup %185  ;;  %v114_v27 = vadd.f32 1e-05, %v110_v25 }
 0x117   :  { %v116_v28 = vmul.f32 %v186_v26, %v113_v19  ;;  %vm122_vm1 = vweird.f32 %v186_v26 }
 0x118   :  { %187 = vrsqrt.f32 %v114_v27  ;;  %vm123_vm3 = vmor %vm121_vm2, %vm122_vm1  ;;  %vm131_vm5 = vweird.f32 %v114_v27 }
 0x119   :  { %v117_v29 = vmul.f32 %v186_v26, %v116_v28 }
 0x11b   :  { %v118_v30 = vmul.f32 0.5, %v117_v29 }
 0x11d   :  { %v119_v31 = vsub.f32 1.5, %v118_v30 }
 0x11e   :  { %v188_v32 = vpop.eup %187 }
 0x11f   :  { %v120_v33 = vmul.f32 %v186_v26, %v119_v31  ;;  %v126_v34 = vmul.f32 %v188_v32, %v114_v27  ;;  %vm132_vm4 = vweird.f32 %v188_v32 }
 0x120   :  { %vm133_vm6 = vmor %vm131_vm5, %vm132_vm4 }
 0x121   :  { %v124_v37 = vsel %vm123_vm3, %v186_v26, %v120_v33  ;;  %v127_v38 = vmul.f32 %v188_v32, %v126_v34 }
 0x122   :  { %v135_v39 = vmul.f32 %v124_v37, %v111_v35 }
 0x123   :  { %v128_v41 = vmul.f32 0.5, %v127_v38 }
 0x124   :  { %v141_v42 = vmul.f32 %v183_v36, %v135_v39 }
 0x125   :  { %v129_v43 = vsub.f32 1.5, %v128_v41 }
 0x126   :  { %v147_v44 = vadd.f32 %v184_v40, %v141_v42 }
 0x127   :  { %v130_v45 = vmul.f32 %v188_v32, %v129_v43 }
 0x128   :  { %149 = vst [vmem:[#allocation7] sm:$0xff] %v147_v44 }
 0x129   :  { %v134_v47 = vsel %vm133_vm6, %v188_v32, %v130_v45 }
 0x12a   :  { %v136_v48 = vmul.f32 %v134_v47, %v112_v46 }
 0x12c   :  { %v142_v49 = vmul.f32 %v183_v36, %v136_v48 }
 0x12e   :  { %v148_v50 = vadd.f32 %v184_v40, %v142_v49 }
 0x130   :  { %150 = vst [vmem:[#allocation7 + $0x8] sm:$0xff] %v148_v50 }
 0x131   :  { %163 = dma.vmem_to_hbm [thread:$0]  %s156_s8, 256, %s158_s11, [#allocation4], %s268_s26, %s268_s26, %s269_s27  }
 0x132   :  { %265 = dma.done.wait [#allocation4], 256  }
 0x133   :  { %266 = vsyncadd [#allocation4], 4294967040 }
 0x134   :  { %168 = vsyncpa [#allocation3], 1 }
 0x135   :  { %169 = vsyncpa [#allocation6], 1 }
 0x136   :  { %170 = vsyncpa [#allocation4], 1 }

// kernel: tpu_custom_call.1
= control target key start
LH: loop header
LB: loop body
LE: loop exit
PB: predicated region body
PF: predicated region fallthrough
CT: control target
= control target key end

     0   :  { %10 = vsyncpa [#allocation3], 0  ;;  %s329_s0 = inlined_call_operand.hbm [shape: f32[16,32], index: 0, kind: input, shape index: {}]   ;;  %s330_s1 = inlined_call_operand.hbm [shape: f32[32,128], index: 1, kind: input, shape index: {}]   ;;  %s331_s2 = inlined_call_operand.vmem [shape: f32[1,128], index: 2, kind: input, shape index: {}]   ;;  %s332_s3 = inlined_call_operand.vmem [shape: f32[1,128], index: 3, kind: input, shape index: {}]   ;;  %s333_s4 = inlined_call_operand.vmem [shape: f32[1,128], index: 4, kind: input, shape index: {}]   ;;  %s334_s5 = inlined_call_operand.hbm [shape: f32[16,128], index: 5, kind: output, shape index: {}]  }
   0x1   :  { %11 = vsyncpa [#allocation6], 0 }
   0x2   :  { %12 = vsyncpa [#allocation4], 0  ;;  %s17_s20 = sshll.u32 %s329_s0, 4  ;;  %s267_s21 = smov [#allocation2]   ;;  %s18_s20 = int_to_ptr.hbm [resolvable:$true] %s17_s20 }
   0x3   :  { %s19_s22 = sshll.u32 %s267_s21, 4  ;;  %s30_s25 = sshll.u32 %s330_s1, 4  ;;  %s20_s22 = int_to_ptr.vmem [resolvable:$true] %s19_s22  ;;  %s31_s25 = int_to_ptr.hbm [resolvable:$true] %s30_s25 }
   0x4   :  { %s268_s26 = smov 128   ;;  %s269_s27 = smov 8  }
   0x5   :  { %25 = dma.hbm_to_vmem [thread:$0]  %s18_s20, 256, %s20_s22, [#allocation3], %s268_s26, %s268_s26, %s269_s27  }
   0x6   :  { %s270_s28 = smov [#allocation5]  }
   0x7   :  { %s32_s29 = sshll.u32 %s270_s28, 4  ;;  %s33_s29 = int_to_ptr.vmem [resolvable:$true] %s32_s29 }
   0x8   :  { %38 = dma.hbm_to_vmem [thread:$0]  %s31_s25, 512, %s33_s29, [#allocation6], %s268_s26, %s268_s26, %s269_s27  }
   0x9   :  { %261 = dma.done.wait [#allocation3], 256  }
   0xa   :  { %262 = vsyncadd [#allocation3], 4294967040 }
   0xb   :  { %263 = dma.done.wait [#allocation6], 512  }
   0xc   :  { %264 = vsyncadd [#allocation6], 4294966784  ;;  %v58_v0 = vld [vmem:[#allocation5 + $0x18] sm:$0xff]  ;;  %v57_v1 = vld [vmem:[#allocation5 + $0x10] sm:$0xff]  ;;  %vm63_vm0 = vcmask 261120   ;;  %s157_s11 = sshll.u32 %s334_s5, 4  ;;  %s158_s11 = int_to_ptr.hbm [resolvable:$true] %s157_s11 }
   0xd   :  { %82 = vmatpush.msra.mxu0 %v58_v0  ;;  %173 = vmatpush.msra.mxu1 %v58_v0  ;;  %v56_v2 = vld [vmem:[#allocation5 + $0x8] sm:$0xff]  ;;  %v55_v3 = vld [vmem:[#allocation5] sm:$0xff]  ;;  %v53_v4 = vld [vmem:[#allocation2] sm:$0xff] }
   0xe   :  { %v54_v5 = vld [vmem:[#allocation2 + $0x8] sm:$0xff]  ;;  %v182_v6 = vld [vmem:[%s331_s2] ss:$0 sm:$0xff] }
   0xf   :  { %83 = vmatpush.msra.mxu0 %v57_v1  ;;  %174 = vmatpush.msra.mxu1 %v57_v1  ;;  %v183_v36 = vld [vmem:[%s332_s3] ss:$0 sm:$0xff]  ;;  %s271_s3 = smov [#allocation7]  }
  0x10   :  { %v184_v40 = vld [vmem:[%s333_s4] ss:$0 sm:$0xff]  ;;  %s155_s8 = sshll.u32 %s271_s3, 4  ;;  %s156_s8 = int_to_ptr.vmem [resolvable:$true] %s155_s8 }
  0x11   :  { %84 = vmatpush.msra.mxu0 %v56_v2  ;;  %175 = vmatpush.msra.mxu1 %v56_v2 }
  0x13   :  { %85 = vmatpush.msra.mxu0 %v55_v3  ;;  %176 = vmatpush.msra.mxu1 %v55_v3 }
  0x14   :  { %171 = vmatmul.msk.f32.vlgmr.msra.gmra.mxu0 %vm63_vm0, %v53_v4  ;;  %172 = vmatmul.msk.f32.vlgmr.msra.gmra.mxu1 %vm63_vm0, %v54_v5 }
  0x91   :  { %v87_v7 = vpop.f32.mrf.mxu0  ;;  %v90_v9 = vpop.f32.mrf.mxu1 }
  0x92   :  { %v88_v8 = vadd.f32 %v182_v6, %v87_v7  ;;  %v91_v11 = vadd.f32 %v182_v6, %v90_v9 }
  0x94   :  { %93 = vadd.xlane.f32.xlu0 %v88_v8  ;;  %v99_v10 = vmul.f32 %v88_v8, %v88_v8  ;;  %v100_v12 = vmul.f32 %v91_v11, %v91_v11 }
  0x96   :  { %101 = vadd.xlane.f32.xlu1 %v99_v10 }
  0x9c   :  { %95 = vadd.xlane.f32.xlu0 %v91_v11 }
  0x9e   :  { %103 = vadd.xlane.f32.xlu1 %v100_v12 }
 0x107   :  { %v94_v13 = vpop.xlane.xlu0 %93 }
 0x108   :  { %v97_v14 = vmul.f32 0.0078125, %v94_v13 }
 0x109   :  { %v102_v15 = vpop.xlane.xlu1 %101 }
 0x10a   :  { %v107_v16 = vmul.f32 %v97_v14, %v97_v14  ;;  %v105_v17 = vmul.f32 0.0078125, %v102_v15  ;;  %v111_v35 = vsub.f32 %v88_v8, %v97_v14 }
 0x10c   :  { %v109_v18 = vsub.f32 %v105_v17, %v107_v16 }
 0x10e   :  { %v113_v19 = vadd.f32 1e-05, %v109_v18 }
 0x10f   :  { %v96_v20 = vpop.xlane.xlu0 %95 }
 0x110   :  { %185 = vrsqrt.f32 %v113_v19  ;;  %v98_v21 = vmul.f32 0.0078125, %v96_v20  ;;  %vm121_vm2 = vweird.f32 %v113_v19 }
 0x111   :  { %v104_v22 = vpop.xlane.xlu1 %103 }
 0x112   :  { %v108_v23 = vmul.f32 %v98_v21, %v98_v21  ;;  %v106_v24 = vmul.f32 0.0078125, %v104_v22  ;;  %v112_v46 = vsub.f32 %v91_v11, %v98_v21 }
 0x114   :  { %v110_v25 = vsub.f32 %v106_v24, %v108_v23 }
 0x116   :  { %v186_v26 = vpop.eup %185  ;;  %v114_v27 = vadd.f32 1e-05, %v110_v25 }
 0x117   :  { %v116_v28 = vmul.f32 %v186_v26, %v113_v19  ;;  %vm122_vm1 = vweird.f32 %v186_v26 }
 0x118   :  { %187 = vrsqrt.f32 %v114_v27  ;;  %vm123_vm3 = vmor %vm121_vm2, %vm122_vm1  ;;  %vm131_vm5 = vweird.f32 %v114_v27 }
 0x119   :  { %v117_v29 = vmul.f32 %v186_v26, %v116_v28 }
 0x11b   :  { %v118_v30 = vmul.f32 0.5, %v117_v29 }
 0x11d   :  { %v119_v31 = vsub.f32 1.5, %v118_v30 }
 0x11e   :  { %v188_v32 = vpop.eup %187 }
 0x11f   :  { %v120_v33 = vmul.f32 %v186_v26, %v119_v31  ;;  %v126_v34 = vmul.f32 %v188_v32, %v114_v27  ;;  %vm132_vm4 = vweird.f32 %v188_v32 }
 0x120   :  { %vm133_vm6 = vmor %vm131_vm5, %vm132_vm4 }
 0x121   :  { %v124_v37 = vsel %vm123_vm3, %v186_v26, %v120_v33  ;;  %v127_v38 = vmul.f32 %v188_v32, %v126_v34 }
 0x122   :  { %v135_v39 = vmul.f32 %v124_v37, %v111_v35 }
 0x123   :  { %v128_v41 = vmul.f32 0.5, %v127_v38 }
 0x124   :  { %v141_v42 = vmul.f32 %v183_v36, %v135_v39 }
 0x125   :  { %v129_v43 = vsub.f32 1.5, %v128_v41 }
 0x126   :  { %v147_v44 = vadd.f32 %v184_v40, %v141_v42 }
 0x127   :  { %v130_v45 = vmul.f32 %v188_v32, %v129_v43 }
 0x128   :  { %149 = vst [vmem:[#allocation7] sm:$0xff] %v147_v44 }
 0x129   :  { %v134_v47 = vsel %vm133_vm6, %v188_v32, %v130_v45 }
 0x12a   :  { %v136_v48 = vmul.f32 %v134_v47, %v112_v46 }
 0x12c   :  { %v142_v49 = vmul.f32 %v183_v36, %v136_v48 }
 0x12e   :  { %v148_v50 = vadd.f32 %v184_v40, %v142_v49 }
 0x130   :  { %150 = vst [vmem:[#allocation7 + $0x8] sm:$0xff] %v148_v50 }
 0x131   :  { %163 = dma.vmem_to_hbm [thread:$0]  %s156_s8, 256, %s158_s11, [#allocation4], %s268_s26, %s268_s26, %s269_s27  }
 0x132   :  { %265 = dma.done.wait [#allocation4], 256  }
 0x133   :  { %266 = vsyncadd [#allocation4], 4294967040 }
 0x134   :  { %168 = vsyncpa [#allocation3], 1 }
 0x135   :  { %169 = vsyncpa [#allocation6], 1 }
 0x136   :  { %170 = vsyncpa [#allocation4], 1 }

</bundles_post_ra>
